<compile_context>
chip_gen: v6e
topology: v6e:2x2x1
jax: 0.10.0
libtpu: 0.0.40
codegen_flags: <defaults>
</compile_context>

<pallas_src>
import jax
import jax.numpy as jnp
from jax.experimental import pallas as pl
from jax.experimental.pallas import tpu as pltpu


def _round_up(x, m):
    return ((x + m - 1) // m) * m


def dqn_kernel(x_ref, w1_ref, b1_ref, w2_ref, b2_ref, w3_ref, b3_ref, o_ref):
    # fc1 + relu : bf16 matmul on the MXU, f32 accumulation, bias/ReLU in f32.
    x = x_ref[...].astype(jnp.bfloat16)  # in-kernel cast, hidden under the input DMA
    h1 = jnp.dot(x, w1_ref[...], preferred_element_type=jnp.float32)
    h1 = jnp.maximum(h1 + b1_ref[...], 0.0).astype(jnp.bfloat16)
    # fc2 + relu
    h2 = jnp.dot(h1, w2_ref[...], preferred_element_type=jnp.float32)
    h2 = jnp.maximum(h2 + b2_ref[...], 0.0).astype(jnp.bfloat16)
    # fc3 (no activation); output block is (TM, 64) f32 — last dim == full array dim.
    out = jnp.dot(h2, w3_ref[...], preferred_element_type=jnp.float32)
    o_ref[...] = (out + b3_ref[...]).astype(o_ref.dtype)


def prepare_params(params):
    """One-time prep (call once, reuse every forward): bf16 weights, f32 (1,out) biases."""
    return {
        "w1": params["w1"].astype(jnp.bfloat16),
        "w2": params["w2"].astype(jnp.bfloat16),
        "w3": params["w3"].astype(jnp.bfloat16),
        "b1": params["b1"].reshape(1, -1).astype(jnp.float32),
        "b2": params["b2"].reshape(1, -1).astype(jnp.float32),
        "b3": params["b3"].reshape(1, -1).astype(jnp.float32),
    }


def dqn_forward(x, prep, *, tm=512):
    """x: (B, input_size) float32.  prep: output of prepare_params().  Returns (B, out) f32."""
    in_size, hid = prep["w1"].shape
    out_size = prep["w3"].shape[1]
    assert x.shape[1] == in_size

    # Pad the batch only to a multiple of 8 (sublane); the grid uses a partial last tile.
    B = x.shape[0]
    Bp = _round_up(B, 8)
    x_in = x if Bp == B else jnp.pad(x, ((0, Bp - B), (0, 0)))

    # Batch tile: multiple of 8, <= requested tm, and small enough that the grid has
    # >= 2 steps whenever the batch allows it (megacore sharding on v7x).
    half = _round_up(-(-Bp // 2), 8)
    tm_eff = max(8, min(tm, half))
    grid = (pl.cdiv(Bp, tm_eff),)

    def act_spec(feat):  # activations: tiled along the batch axis
        return pl.BlockSpec((tm_eff, feat), lambda i: (i, 0))

    def res_spec(shape):  # weights/biases: VMEM-resident across all grid steps
        return pl.BlockSpec(shape, lambda i: (0, 0))

    flops = 2 * Bp * (in_size * hid + hid * hid + hid * out_size)
    bytes_accessed = (
        Bp * in_size * 4                                     # x (f32)
        + Bp * out_size * 4                                  # out (f32)
        + (in_size * hid + hid * hid + hid * out_size) * 2   # weights (bf16)
        + (2 * hid + out_size) * 4)                          # biases (f32)
    cost = pl.CostEstimate(flops=flops, transcendentals=0,
                           bytes_accessed=bytes_accessed)

    out = pl.pallas_call(
        dqn_kernel,
        out_shape=jax.ShapeDtypeStruct((Bp, out_size), jnp.float32),
        grid=grid,
        in_specs=[
            act_spec(in_size),
            res_spec(prep["w1"].shape), res_spec(prep["b1"].shape),
            res_spec(prep["w2"].shape), res_spec(prep["b2"].shape),
            res_spec(prep["w3"].shape), res_spec(prep["b3"].shape),
        ],
        out_specs=act_spec(out_size),
        compiler_params=pltpu.CompilerParams(
            dimension_semantics=("parallel",)),
        cost_estimate=cost,
    )(x_in, prep["w1"], prep["b1"], prep["w2"], prep["b2"],
      prep["w3"], prep["b3"])

    return out if Bp == B else out[:B]


def init_params(key, input_size=64, hidden_size=128, output_size=64):
    """Deterministic init matching nn.Linear (weights stored transposed as (in, out))."""
    ks = jax.random.split(key, 6)

    def u(k, shape, fan_in):
        bound = 1.0 / jnp.sqrt(fan_in)
        return jax.random.uniform(k, shape, jnp.float32, -bound, bound)

    return {
        "w1": u(ks[0], (input_size, hidden_size), input_size),
        "b1": u(ks[1], (hidden_size,), input_size),
        "w2": u(ks[2], (hidden_size, hidden_size), hidden_size),
        "b2": u(ks[3], (hidden_size,), hidden_size),
        "w3": u(ks[4], (hidden_size, output_size), hidden_size),
        "b3": u(ks[5], (output_size,), hidden_size),
    }


def dqn_reference(x, p):
    """Reference with the same bf16-operand / f32-accumulate numerics as the kernel."""
    xb = x.astype(jnp.bfloat16)
    w1 = p["w1"].astype(jnp.bfloat16)
    w2 = p["w2"].astype(jnp.bfloat16)
    w3 = p["w3"].astype(jnp.bfloat16)
    h1 = jnp.maximum(
        jnp.dot(xb, w1, preferred_element_type=jnp.float32) + p["b1"], 0.0
    ).astype(jnp.bfloat16)
    h2 = jnp.maximum(
        jnp.dot(h1, w2, preferred_element_type=jnp.float32) + p["b2"], 0.0
    ).astype(jnp.bfloat16)
    return jnp.dot(h2, w3, preferred_element_type=jnp.float32) + p["b3"]


if __name__ == "__main__":
    key = jax.random.PRNGKey(0)
    k_param, k_x1, k_x2 = jax.random.split(key, 3)

    input_size, hidden_size, output_size = 64, 128, 64
    params = init_params(k_param, input_size, hidden_size, output_size)
    prep = prepare_params(params)  # one-time weight/bias prep, hoisted out of forward

    # Small single-tile case (batch already a multiple of 8, grid of 1).
    batch = 8
    x = jax.random.normal(k_x1, (batch, input_size), jnp.float32)
    out = jax.block_until_ready(dqn_forward(x, prep))
    ref = dqn_reference(x, params)
    assert out.shape == (batch, output_size)
    assert jnp.allclose(out, ref, atol=2e-2, rtol=2e-2)

    # Non-multiple-of-8 batch: exercises pad-to-8, grid of 3, and a partial last tile.
    batch2 = 300
    x2 = jax.random.normal(k_x2, (batch2, input_size), jnp.float32)
    out2 = jax.block_until_ready(dqn_forward(x2, prep, tm=128))
    ref2 = dqn_reference(x2, params)
    assert out2.shape == (batch2, output_size)
    assert jnp.allclose(out2, ref2, atol=2e-2, rtol=2e-2)

    # TODO(synk): training loop / replay buffer / optimizer from the original script are
    # out of scope for this forward-pass kernel.
    print("KERNEL_OK")
</pallas_src>

<mosaic_0001>
module attributes {stable_mosaic.version = 11 : i64} {
  func.func @dqn_kernel(%arg0: i32, %arg1: memref<8x64xf32, #tpu.memory_space<vmem>>, %arg2: memref<64x128xbf16, #tpu.memory_space<vmem>>, %arg3: memref<1x128xf32, #tpu.memory_space<vmem>>, %arg4: memref<128x128xbf16, #tpu.memory_space<vmem>>, %arg5: memref<1x128xf32, #tpu.memory_space<vmem>>, %arg6: memref<128x64xbf16, #tpu.memory_space<vmem>>, %arg7: memref<1x64xf32, #tpu.memory_space<vmem>>, %arg8: memref<8x64xf32, #tpu.memory_space<vmem>>) attributes {dimension_semantics = [#tpu.dimension_semantics<parallel>], iteration_bounds = array<i64: 1>, scalar_prefetch = 0 : i64, scratch_operands = 0 : i64, tpu.core_type = #tpu.core_type<tc>, window_params = [{transform_indices = @transform_0, window_bounds = array<i64: 8, 64>}, {pipeline_mode = #tpu.pipeline_mode<synchronous>, transform_indices = @transform_1, window_bounds = array<i64: 64, 128>}, {pipeline_mode = #tpu.pipeline_mode<synchronous>, transform_indices = @transform_2, window_bounds = array<i64: 1, 128>}, {pipeline_mode = #tpu.pipeline_mode<synchronous>, transform_indices = @transform_3, window_bounds = array<i64: 128, 128>}, {pipeline_mode = #tpu.pipeline_mode<synchronous>, transform_indices = @transform_4, window_bounds = array<i64: 1, 128>}, {pipeline_mode = #tpu.pipeline_mode<synchronous>, transform_indices = @transform_5, window_bounds = array<i64: 128, 64>}, {pipeline_mode = #tpu.pipeline_mode<synchronous>, transform_indices = @transform_6, window_bounds = array<i64: 1, 64>}, {transform_indices = @transform_7, window_bounds = array<i64: 8, 64>}]} {
    %c0 = arith.constant 0 : index
    %c0_0 = arith.constant 0 : index
    %0 = vector.load %arg1[%c0, %c0_0] : memref<8x64xf32, #tpu.memory_space<vmem>>, vector<8x64xf32>
    %1 = arith.truncf %0 : vector<8x64xf32> to vector<8x64xbf16>
    %c0_1 = arith.constant 0 : index
    %c0_2 = arith.constant 0 : index
    %2 = vector.load %arg2[%c0_1, %c0_2] : memref<64x128xbf16, #tpu.memory_space<vmem>>, vector<64x128xbf16>
    %cst = arith.constant dense<0.000000e+00> : vector<8x128xf32>
    %3 = tpu.matmul %1, %2, %cst {dimension_numbers = #tpu.dot_dimension_numbers<[1], [0], [0], [1], [0, 0, 1, 1], [], []>} : vector<8x64xbf16>, vector<64x128xbf16>, vector<8x128xf32> -> vector<8x128xf32>
    %c0_3 = arith.constant 0 : index
    %c0_4 = arith.constant 0 : index
    %4 = vector.load %arg3[%c0_3, %c0_4] : memref<1x128xf32, #tpu.memory_space<vmem>>, vector<1x128xf32>
    %5 = vector.broadcast %4 : vector<1x128xf32> to vector<8x128xf32>
    %6 = arith.addf %3, %5 : vector<8x128xf32>
    %cst_5 = arith.constant 0.000000e+00 : f32
    %7 = vector.broadcast %cst_5 : f32 to vector<8x128xf32>
    %8 = arith.maximumf %6, %7 : vector<8x128xf32>
    %9 = arith.truncf %8 : vector<8x128xf32> to vector<8x128xbf16>
    %c0_6 = arith.constant 0 : index
    %c0_7 = arith.constant 0 : index
    %10 = vector.load %arg4[%c0_6, %c0_7] : memref<128x128xbf16, #tpu.memory_space<vmem>>, vector<128x128xbf16>
    %cst_8 = arith.constant dense<0.000000e+00> : vector<8x128xf32>
    %11 = tpu.matmul %9, %10, %cst_8 {dimension_numbers = #tpu.dot_dimension_numbers<[1], [0], [0], [1], [0, 0, 1, 1], [], []>} : vector<8x128xbf16>, vector<128x128xbf16>, vector<8x128xf32> -> vector<8x128xf32>
    %c0_9 = arith.constant 0 : index
    %c0_10 = arith.constant 0 : index
    %12 = vector.load %arg5[%c0_9, %c0_10] : memref<1x128xf32, #tpu.memory_space<vmem>>, vector<1x128xf32>
    %13 = vector.broadcast %12 : vector<1x128xf32> to vector<8x128xf32>
    %14 = arith.addf %11, %13 : vector<8x128xf32>
    %cst_11 = arith.constant 0.000000e+00 : f32
    %15 = vector.broadcast %cst_11 : f32 to vector<8x128xf32>
    %16 = arith.maximumf %14, %15 : vector<8x128xf32>
    %17 = arith.truncf %16 : vector<8x128xf32> to vector<8x128xbf16>
    %c0_12 = arith.constant 0 : index
    %c0_13 = arith.constant 0 : index
    %18 = vector.load %arg6[%c0_12, %c0_13] : memref<128x64xbf16, #tpu.memory_space<vmem>>, vector<128x64xbf16>
    %cst_14 = arith.constant dense<0.000000e+00> : vector<8x64xf32>
    %19 = tpu.matmul %17, %18, %cst_14 {dimension_numbers = #tpu.dot_dimension_numbers<[1], [0], [0], [1], [0, 0, 1, 1], [], []>} : vector<8x128xbf16>, vector<128x64xbf16>, vector<8x64xf32> -> vector<8x64xf32>
    %c0_15 = arith.constant 0 : index
    %c0_16 = arith.constant 0 : index
    %20 = vector.load %arg7[%c0_15, %c0_16] : memref<1x64xf32, #tpu.memory_space<vmem>>, vector<1x64xf32>
    %21 = vector.broadcast %20 : vector<1x64xf32> to vector<8x64xf32>
    %22 = arith.addf %19, %21 : vector<8x64xf32>
    %c0_17 = arith.constant 0 : index
    %c0_18 = arith.constant 0 : index
    %23 = vector.load %arg8[%c0_17, %c0_18] : memref<8x64xf32, #tpu.memory_space<vmem>>, vector<8x64xf32>
    tpu.vector_store %arg8[%c0_17, %c0_18], %22 {strides = array<i32>} : memref<8x64xf32, #tpu.memory_space<vmem>>, vector<8x64xf32>,
    return
  }
  func.func @transform_0(%arg0: i32) -> (i32, i32) {
    %c0_i32 = arith.constant 0 : i32
    %c0_i32_0 = arith.constant 0 : i32
    return %arg0, %c0_i32 : i32, i32
  }
  func.func @transform_1(%arg0: i32) -> (i32, i32) {
    %c0_i32 = arith.constant 0 : i32
    %c0_i32_0 = arith.constant 0 : i32
    %c0_i32_1 = arith.constant 0 : i32
    return %c0_i32, %c0_i32_0 : i32, i32
  }
  func.func @transform_2(%arg0: i32) -> (i32, i32) {
    %c0_i32 = arith.constant 0 : i32
    %c0_i32_0 = arith.constant 0 : i32
    %c0_i32_1 = arith.constant 0 : i32
    return %c0_i32, %c0_i32_0 : i32, i32
  }
  func.func @transform_3(%arg0: i32) -> (i32, i32) {
    %c0_i32 = arith.constant 0 : i32
    %c0_i32_0 = arith.constant 0 : i32
    %c0_i32_1 = arith.constant 0 : i32
    return %c0_i32, %c0_i32_0 : i32, i32
  }
  func.func @transform_4(%arg0: i32) -> (i32, i32) {
    %c0_i32 = arith.constant 0 : i32
    %c0_i32_0 = arith.constant 0 : i32
    %c0_i32_1 = arith.constant 0 : i32
    return %c0_i32, %c0_i32_0 : i32, i32
  }
  func.func @transform_5(%arg0: i32) -> (i32, i32) {
    %c0_i32 = arith.constant 0 : i32
    %c0_i32_0 = arith.constant 0 : i32
    %c0_i32_1 = arith.constant 0 : i32
    return %c0_i32, %c0_i32_0 : i32, i32
  }
  func.func @transform_6(%arg0: i32) -> (i32, i32) {
    %c0_i32 = arith.constant 0 : i32
    %c0_i32_0 = arith.constant 0 : i32
    %c0_i32_1 = arith.constant 0 : i32
    return %c0_i32, %c0_i32_0 : i32, i32
  }
  func.func @transform_7(%arg0: i32) -> (i32, i32) {
    %c0_i32 = arith.constant 0 : i32
    %c0_i32_0 = arith.constant 0 : i32
    return %arg0, %c0_i32 : i32, i32
  }
}

</mosaic_0001>

<bundles_post_ra>
// kernel: tpu_custom_call.1
= control target key start
LH: loop header
LB: loop body
LE: loop exit
PB: predicated region body
PF: predicated region fallthrough
CT: control target
= control target key end

     0   :  { %12 = vsyncpa [#allocation3], 0  ;;  %s681_s0 = inlined_call_operand.hbm [shape: f32[8,64], index: 0, kind: input, shape index: {}]   ;;  %s682_s1 = inlined_call_operand.vmem [shape: bf16[64,128], index: 1, kind: input, shape index: {}]   ;;  %s683_s2 = inlined_call_operand.vmem [shape: f32[1,128], index: 2, kind: input, shape index: {}]   ;;  %s684_s3 = inlined_call_operand.vmem [shape: bf16[128,128], index: 3, kind: input, shape index: {}]   ;;  %s685_s4 = inlined_call_operand.vmem [shape: f32[1,128], index: 4, kind: input, shape index: {}]   ;;  %s686_s5 = inlined_call_operand.vmem [shape: bf16[128,64], index: 5, kind: input, shape index: {}]   ;;  %s687_s6 = inlined_call_operand.vmem [shape: f32[1,64], index: 6, kind: input, shape index: {}]   ;;  %s688_s7 = inlined_call_operand.hbm [shape: f32[8,64], index: 7, kind: output, shape index: {}]  }
   0x1   :  { %13 = vsyncpa [#allocation4], 0  ;;  %s534_s24 = smov [#allocation2]  }
   0x2   :  { %s20_s25 = sshll.u32 %s534_s24, 4  ;;  %s21_s25 = int_to_ptr.vmem [resolvable:$true] %s20_s25 }
   0x3   :  { %s498_s26 = scalar_lea.vmem %s21_s25, 128  ;;  %p503_p1 = scmp.lt.s32.totalorder %s21_s25, %s21_s25 }
   0x4   :  { %p499_p0 = scmp.ne.s32.totalorder %s21_s25, %s498_s26  ;;  %p504_p2 = scmp.lt.s32.totalorder %s498_s26, %s498_s26 }
   0x6   :  { %p505_p3 = por %p504_p2, %p503_p1 }
   0x8   :  { %p506_p4 = pnand %p505_p3, %p499_p0 }
   0xa   :  { %509 = shalt.err (!%p506_p4)
}
   0xb   :  { %23 = dma.hbm_to_vmem [thread:$0]  %s681_s0, 128, %s21_s25, [#allocation3]  }
   0xc   :  { %530 = dma.done.wait [#allocation3], 128  }
   0xd   :  { %531 = vsyncadd [#allocation3], 4294967168  ;;  %v535_v0 = vmov 0.0   ;;  %vm536_vm0 = vmmov 0   ;;  %v470_v1 = vld [vmem:[%s682_s1 + $0x18] sm:$0xff]   ;;  %v471_v2 = vld [vmem:[%s682_s1 + $0x10] sm:$0xff]  }
   0xe   :  { %414 = vmatprep.subr.bf16.mxu0 %v535_v0  ;;  %422 = vmatprep.mubr.msk.bf16.mxu0 %vm536_vm0, %v535_v0  ;;  %v474_v3 = vld [vmem:[%s684_s3 + $0x38] sm:$0xff]   ;;  %v472_v4 = vld [vmem:[%s682_s1 + $0x8] sm:$0xff]   ;;  %v475_v5 = vld [vmem:[%s684_s3 + $0x30] sm:$0xff]   ;;  %vm81_vm1 = vcmask 523264   ;;  %s537_s23 = smov [#allocation5]  }
   0xf   :  { %426 = vmatprep.subr.bf16.mxu1 %v535_v0  ;;  %442 = vmatprep.mubr.msk.bf16.mxu1 %vm536_vm0, %v535_v0  ;;  %v473_v6 = vld [vmem:[%s682_s1] sm:$0xff]   ;;  %v476_v8 = vld [vmem:[%s684_s3 + $0x28] sm:$0xff]   ;;  %v478_v11 = vld [vmem:[%s684_s3 + $0x18] sm:$0xff]   ;;  %s358_s24 = sshll.u32 %s537_s23, 4  ;;  %s359_s24 = int_to_ptr.vmem [resolvable:$true] %s358_s24 }
  0x10   :  { %415 = vmatpush3.bf16.msra.mxu0 %v470_v1  ;;  %427 = vmatpush3.bf16.msra.mxu1 %v474_v3  ;;  %v40_v7 = vld [vmem:[#allocation2] sm:$0xff]  ;;  %v479_v12 = vld [vmem:[%s684_s3 + $0x10] sm:$0xff]   ;;  %v480_v13 = vld [vmem:[%s684_s3 + $0x8] sm:$0xff]   ;;  %p515_p6 = scmp.lt.s32.totalorder %s359_s24, %s359_s24 }
  0x11   :  { %416 = vmatprep.subr.bf16.mxu0 %v535_v0  ;;  %428 = vmatprep.subr.bf16.mxu1 %v535_v0  ;;  %v41_v9 = vpack.c.bf16 %v40_v7, %v40_v7  ;;  %v477_v10 = vld [vmem:[%s684_s3 + $0x20] sm:$0xff]   ;;  %v482_v15 = vld [vmem:[%s686_s5 + $0x38] sm:$0xff]   ;;  %v483_v16 = vld [vmem:[%s686_s5 + $0x30] sm:$0xff]  }
  0x12   :  { %v481_v14 = vld [vmem:[%s684_s3] sm:$0xff]   ;;  %v484_v17 = vld [vmem:[%s686_s5 + $0x28] sm:$0xff]   ;;  %v486_v19 = vld [vmem:[%s686_s5 + $0x18] sm:$0xff]  }
  0x13   :  { %v485_v18 = vld [vmem:[%s686_s5 + $0x20] sm:$0xff]   ;;  %v487_v20 = vld [vmem:[%s686_s5 + $0x10] sm:$0xff]   ;;  %v488_v29 = vld [vmem:[%s686_s5 + $0x8] sm:$0xff]  }
  0x14   :  { %417 = vmatpush3.bf16.msra.mxu0 %v471_v2  ;;  %429 = vmatpush3.bf16.msra.mxu1 %v475_v5  ;;  %v367_v21 = vld [vmem:[%s683_s2] ss:$0 sm:$0xff] }
  0x15   :  { %418 = vmatprep.subr.bf16.mxu0 %v535_v0  ;;  %430 = vmatprep.subr.bf16.mxu1 %v535_v0  ;;  %v489_v30 = vld [vmem:[%s686_s5] sm:$0xff]  }
  0x16   :  { %v373_v31 = vld [vmem:[%s685_s4] ss:$0 sm:$0xff]  ;;  %s510_s4 = scalar_lea.vmem %s359_s24, 128 }
  0x17   :  { %v382_v39 = vld [vmem:[%s687_s6] ss:$0 sm:$0xff]  ;;  %p511_p5 = scmp.ne.s32.totalorder %s359_s24, %s510_s4  ;;  %p516_p7 = scmp.lt.s32.totalorder %s510_s4, %s510_s4 }
  0x18   :  { %419 = vmatpush3.bf16.msra.mxu0 %v472_v4  ;;  %431 = vmatpush3.bf16.msra.mxu1 %v476_v8 }
  0x19   :  { %420 = vmatprep.subr.bf16.mxu0 %v535_v0  ;;  %432 = vmatprep.subr.bf16.mxu1 %v535_v0  ;;  %p517_p8 = por %p516_p7, %p515_p6 }
  0x1b   :  { %p518_p9 = pnand %p517_p8, %p511_p5 }
  0x1c   :  { %421 = vmatpush3.bf16.msra.mxu0 %v473_v6  ;;  %433 = vmatpush3.bf16.msra.mxu1 %v477_v10 }
  0x1d   :  { %446 = vmatprep.subr.bf16.mxu0 %v535_v0  ;;  %434 = vmatprep.subr.bf16.mxu1 %v535_v0 }
  0x1f   :  { %423 = vmatmul.mubr.msk.bf16.vlgmr.msra.gmra.mxu0 %vm81_vm1, %v41_v9 }
  0x20   :  { %462 = vmatprep.mubr.msk.bf16.mxu0 %vm536_vm0, %v535_v0  ;;  %435 = vmatpush3.bf16.msra.mxu1 %v478_v11 }
  0x21   :  { %436 = vmatprep.subr.bf16.mxu1 %v535_v0  ;;  %447 = vmatpush3.bf16.msra.mxu0 %v482_v15 }
  0x22   :  { %448 = vmatprep.subr.bf16.mxu0 %v535_v0 }
  0x24   :  { %437 = vmatpush3.bf16.msra.mxu1 %v479_v12 }
  0x25   :  { %438 = vmatprep.subr.bf16.mxu1 %v535_v0  ;;  %449 = vmatpush3.bf16.msra.mxu0 %v483_v16 }
  0x26   :  { %450 = vmatprep.subr.bf16.mxu0 %v535_v0 }
  0x28   :  { %439 = vmatpush3.bf16.msra.mxu1 %v480_v13 }
  0x29   :  { %440 = vmatprep.subr.bf16.mxu1 %v535_v0  ;;  %451 = vmatpush3.bf16.msra.mxu0 %v484_v17 }
  0x2a   :  { %452 = vmatprep.subr.bf16.mxu0 %v535_v0 }
  0x2c   :  { %441 = vmatpush3.bf16.msra.mxu1 %v481_v14 }
  0x2d   :  { %453 = vmatpush3.bf16.msra.mxu0 %v485_v18 }
  0x2e   :  { %454 = vmatprep.subr.bf16.mxu0 %v535_v0 }
  0x31   :  { %455 = vmatpush3.bf16.msra.mxu0 %v486_v19 }
  0x32   :  { %456 = vmatprep.subr.bf16.mxu0 %v535_v0 }
  0x35   :  { %457 = vmatpush3.bf16.msra.mxu0 %v487_v20 }
  0x36   :  { %458 = vmatprep.subr.bf16.mxu0 %v535_v0 }
  0x39   :  { %459 = vmatpush3.bf16.msra.mxu0 %v488_v29 }
  0x3a   :  { %460 = vmatprep.subr.bf16.mxu0 %v535_v0 }
  0x3d   :  { %461 = vmatpush3.bf16.msra.mxu0 %v489_v30 }
  0xdf   :  { %v119_v22 = vpop.f32.mrf.mxu0 }
  0xe0   :  { %v120_v23 = vadd.f32 %v367_v21, %v119_v22 }
  0xe1   :  { %v424_v24 = vpop.f32.mrf.mxu0 }
  0xe2   :  { %v125_v25 = vmax.f32 %v120_v23, 0.0 }
  0xe3   :  { %v122_v26 = vpop.f32.mrf.mxu0 }
  0xe4   :  { %v126_v27 = vpack.c.bf16 %v125_v25, %v125_v25 }
  0xe5   :  { %v425_v28 = vpop.f32.mrf.mxu0 }
  0xe6   :  { %443 = vmatmul.mubr.bf16.vlgmr.msra.gmra.mxu1 %v126_v27 }
 0x1a6   :  { %v232_v32 = vpop.f32.mrf.mxu1 }
 0x1a7   :  { %v233_v33 = vadd.f32 %v373_v31, %v232_v32 }
 0x1a8   :  { %v444_v34 = vpop.f32.mrf.mxu1 }
 0x1a9   :  { %v238_v35 = vmax.f32 %v233_v33, 0.0 }
 0x1aa   :  { %v235_v36 = vpop.f32.mrf.mxu1 }
 0x1ab   :  { %v239_v37 = vpack.c.bf16 %v238_v35, %v238_v35 }
 0x1ac   :  { %v445_v38 = vpop.f32.mrf.mxu1 }
 0x1ad   :  { %463 = vmatmul.mubr.bf16.vlgmr.msra.gmra.mxu0 %v239_v37 }
 0x26d   :  { %v345_v40 = vpop.f32.mrf.mxu0 }
 0x26e   :  { %v346_v41 = vadd.f32 %v382_v39, %v345_v40 }
 0x26f   :  { %v464_v42 = vpop.f32.mrf.mxu0 }
 0x270   :  { %351 = vst.msk [vmem:[#allocation5] sm:$0xff] %vm81_vm1, %v346_v41 }
 0x271   :  { %v348_v43 = vpop.f32.mrf.mxu0 }
 0x272   :  { %521 = shalt.err (!%p518_p9)
}
 0x273   :  { %361 = dma.vmem_to_hbm [thread:$0]  %s359_s24, 128, %s688_s7, [#allocation4]   ;;  %v465_v44 = vpop.f32.mrf.mxu0 }
 0x274   :  { %532 = dma.done.wait [#allocation4], 128  }
 0x275   :  { %533 = vsyncadd [#allocation4], 4294967168 }
 0x276   :  { %365 = vsyncpa [#allocation3], 1 }
 0x277   :  { %366 = vsyncpa [#allocation4], 1 }

</bundles_post_ra>
